<compile_context>
chip_gen: v5e
topology: v5e:2x2
jax: 0.10.0
libtpu: 0.0.40
codegen_flags: <defaults>
</compile_context>

<pallas_src>
import functools

import jax
import jax.numpy as jnp
from jax.experimental import pallas as pl
from jax.experimental.pallas import tpu as pltpu


def _round_up(v, m):
    return ((v + m - 1) // m) * m


# -----------------------------------------------------------------------------
# Single fused kernel: conv3x3 (3-tap shifted matmul) + bias + ReLU
#                      + global average pool + fc + log_softmax.
#   grid = (N,)  -- one full image per step, batch axis "parallel".
# -----------------------------------------------------------------------------
def fused_conv_pool_head_kernel(x_ref, wc_ref, bc_ref, wf_ref, bf_ref, o_ref,
                                *, h, w, nclass, inv_hw):
    # x_ref : (1, h+2, w, Kpad) bf16  width-im2col'd rows (kw-major, c-minor)
    #                                 with a 1-row halo top/bottom, Kpad = 3C->128
    # wc_ref: (3, Kpad, Fpad)   bf16  conv weight, tap kh -> [(kw*C + c), f]
    # bc_ref: (1, Fpad)         f32   conv bias
    # wf_ref: (Fpad, Cpad)      bf16  fc weight (PyTorch weight.T), class-padded
    # bf_ref: (1, Cpad)         f32   fc bias
    # o_ref : (1, 1, Cpad)      f32   log-probabilities (pad lanes garbage)
    hw = h * w
    k_pad = wc_ref.shape[1]
    f_pad = wf_ref.shape[0]

    # --- conv3x3 (stride 1, pad 1): 3 shifted matmuls, one per height tap ---
    acc = jnp.zeros((hw, f_pad), jnp.float32)
    for kh in range(3):
        xt = x_ref[0, kh:kh + h, :, :]       # slice on the untiled dim only
        xt = xt.reshape(hw, k_pad)           # collapse (h, w) -> GEMM M dim
        acc = acc + jnp.dot(xt, wc_ref[kh], preferred_element_type=jnp.float32)

    feat = jnp.maximum(acc + bc_ref[...], 0.0)                 # bias + ReLU (f32)

    # --- global average pool over H*W (VPU adds + one cross-sublane reduce) ---
    pooled = jnp.sum(feat, axis=0, keepdims=True) * inv_hw     # (1, Fpad) f32

    # --- fc + log_softmax on lane-padded class dim (fused head) ---
    pooled8 = jnp.broadcast_to(pooled.astype(wf_ref.dtype), (8, f_pad))
    logits8 = jnp.dot(pooled8, wf_ref[...], preferred_element_type=jnp.float32)
    logits = logits8[0:1, :] + bf_ref[...]                     # (1, Cpad)
    col = jax.lax.broadcasted_iota(jnp.int32, logits.shape, 1)
    logits = jnp.where(col < nclass, logits, -1e30)            # mask pad classes
    m = jnp.max(logits, axis=-1, keepdims=True)
    z = logits - m
    lse = jnp.log(jnp.sum(jnp.exp(z), axis=-1, keepdims=True))
    o_ref[...] = (z - lse)[None].astype(o_ref.dtype)


# -----------------------------------------------------------------------------
# Wrapper (layout conversion, padding, pallas_call glue)
# -----------------------------------------------------------------------------
@jax.jit
def model_forward(x_nchw, conv_w, conv_b, fc_w, fc_b):
    """x_nchw: (N, C, H, W) f32; conv_w: (3, 3, C, F); fc_w: (F, nclass).
    Returns log-probabilities (N, nclass) f32."""
    n, c, h, w = x_nchw.shape
    f = conv_w.shape[-1]
    nclass = fc_w.shape[-1]
    hw = h * w

    k = 3 * c                                 # width-tap packed channels
    k_pad = _round_up(k, 128)
    f_pad = _round_up(f, 128)
    ncls_pad = _round_up(nclass, 128)

    # TODO(synk): accept NHWC bf16 input directly to drop this extra HBM pass.
    x_nhwc = jnp.transpose(x_nchw, (0, 2, 3, 1))
    xpad = jnp.pad(x_nhwc, ((0, 0), (1, 1), (1, 1), (0, 0)))   # (N, H+2, W+2, C)
    # Width-only im2col: channel order (kw, c).  3x the input, not 9x.
    xw = jnp.concatenate([xpad[:, :, kw:kw + w, :] for kw in range(3)], axis=-1)
    xw = jnp.pad(xw, ((0, 0), (0, 0), (0, 0), (0, k_pad - k)))
    xw = xw.astype(jnp.bfloat16)                               # (N, H+2, W, Kpad)

    # Conv weight (kh, kw, C, F) -> (3, 3C, F) with (kw, c) flattened kw-major.
    wc = conv_w.reshape(3, 3 * c, f)
    wc = jnp.pad(wc, ((0, 0), (0, k_pad - k), (0, f_pad - f))).astype(jnp.bfloat16)
    bc = jnp.pad(conv_b.reshape(1, f), ((0, 0), (0, f_pad - f))).astype(jnp.float32)
    wf = jnp.pad(fc_w, ((0, f_pad - f), (0, ncls_pad - nclass))).astype(jnp.bfloat16)
    bf = jnp.pad(fc_b.reshape(1, nclass),
                 ((0, 0), (0, ncls_pad - nclass))).astype(jnp.float32)

    flops = 2 * n * hw * 3 * k_pad * f_pad + 2 * n * 8 * f_pad * ncls_pad
    bytes_accessed = (xw.size * 2 + wc.size * 2 + bc.size * 4 + wf.size * 2
                      + bf.size * 4 + n * ncls_pad * 4)

    out = pl.pallas_call(
        functools.partial(fused_conv_pool_head_kernel,
                          h=h, w=w, nclass=nclass, inv_hw=1.0 / float(hw)),
        out_shape=jax.ShapeDtypeStruct((n, 1, ncls_pad), jnp.float32),
        grid_spec=pltpu.PrefetchScalarGridSpec(
            num_scalar_prefetch=0,
            grid=(n,),
            in_specs=[
                pl.BlockSpec((1, h + 2, w, k_pad), lambda i: (i, 0, 0, 0)),
                pl.BlockSpec((3, k_pad, f_pad), lambda i: (0, 0, 0)),
                pl.BlockSpec((1, f_pad), lambda i: (0, 0)),
                pl.BlockSpec((f_pad, ncls_pad), lambda i: (0, 0)),
                pl.BlockSpec((1, ncls_pad), lambda i: (0, 0)),
            ],
            out_specs=pl.BlockSpec((1, 1, ncls_pad), lambda i: (i, 0, 0)),
        ),
        compiler_params=pltpu.CompilerParams(
            dimension_semantics=("parallel",),
            vmem_limit_bytes=32 * 1024 * 1024),
        cost_estimate=pl.CostEstimate(
            flops=int(flops),
            transcendentals=int(n * (ncls_pad + 1)),
            bytes_accessed=int(bytes_accessed)),
    )(xw, wc, bc, wf, bf)
    return out[:, 0, :nclass]


def reference_forward(x_nchw, conv_w, conv_b, fc_w, fc_b):
    """Pure-JAX f32 reference (same math, no padding / bf16)."""
    n, c, h, w = x_nchw.shape
    f = conv_w.shape[-1]
    x_nhwc = jnp.transpose(x_nchw, (0, 2, 3, 1))
    xpad = jnp.pad(x_nhwc, ((0, 0), (1, 1), (1, 1), (0, 0)))
    acc = jnp.zeros((n, h, w, f), jnp.float32)
    for kh in range(3):
        for kw in range(3):
            acc = acc + jnp.einsum("nhwc,cf->nhwf",
                                   xpad[:, kh:kh + h, kw:kw + w, :],
                                   conv_w[kh, kw])
    feat = jnp.maximum(acc + conv_b, 0.0)
    pooled = jnp.mean(feat, axis=(1, 2))
    logits = pooled @ fc_w + fc_b
    return jax.nn.log_softmax(logits, axis=-1)


if __name__ == "__main__":
    # Small, deterministic shapes consistent with the module's forward:
    N, C, H, W = 2, 4, 16, 16
    F_CH = 16      # conv output channels
    NCLASS = 10    # nn.Linear(in_features, nclass)

    key = jax.random.PRNGKey(0)
    k_x, k_cw, k_cb, k_fw, k_fb = jax.random.split(key, 5)

    x = jax.random.normal(k_x, (N, C, H, W), dtype=jnp.float32)
    # conv weight stored as (kh, kw, C, F); fc weight stored as (F, nclass)
    # (== PyTorch weight.T).
    conv_w = 0.1 * jax.random.normal(k_cw, (3, 3, C, F_CH), dtype=jnp.float32)
    conv_b = 0.1 * jax.random.normal(k_cb, (F_CH,), dtype=jnp.float32)
    fc_w = 0.1 * jax.random.normal(k_fw, (F_CH, NCLASS), dtype=jnp.float32)
    fc_b = 0.1 * jax.random.normal(k_fb, (NCLASS,), dtype=jnp.float32)

    out = model_forward(x, conv_w, conv_b, fc_w, fc_b)
    jax.block_until_ready(out)

    ref = reference_forward(x, conv_w, conv_b, fc_w, fc_b)

    assert out.shape == (N, NCLASS)
    # Rows of log_softmax must exp-sum to 1 (pad lanes masked out correctly).
    probs_sum = jnp.sum(jnp.exp(out), axis=-1)
    assert bool(jnp.all(jnp.abs(probs_sum - 1.0) < 1e-4))
    # Matches the pure-JAX reference within bf16 tolerance.
    assert bool(jnp.max(jnp.abs(out - ref)) < 5e-2)

    print("KERNEL_OK")
</pallas_src>

<mosaic_0001>
module attributes {stable_mosaic.version = 11 : i64} {
  func.func @fused_conv_pool_head_kernel(%arg0: i32, %arg1: memref<1x18x16x128xbf16, #tpu.memory_space<vmem>>, %arg2: memref<3x128x128xbf16, #tpu.memory_space<vmem>>, %arg3: memref<1x128xf32, #tpu.memory_space<vmem>>, %arg4: memref<128x128xbf16, #tpu.memory_space<vmem>>, %arg5: memref<1x128xf32, #tpu.memory_space<vmem>>, %arg6: memref<1x1x128xf32, #tpu.memory_space<vmem>>) attributes {dimension_semantics = [#tpu.dimension_semantics<parallel>], iteration_bounds = array<i64: 2>, scalar_prefetch = 0 : i64, scratch_operands = 0 : i64, tpu.core_type = #tpu.core_type<tc>, window_params = [{transform_indices = @transform_0, window_bounds = array<i64: 1, 18, 16, 128>}, {pipeline_mode = #tpu.pipeline_mode<synchronous>, transform_indices = @transform_1, window_bounds = array<i64: 3, 128, 128>}, {pipeline_mode = #tpu.pipeline_mode<synchronous>, transform_indices = @transform_2, window_bounds = array<i64: 1, 128>}, {pipeline_mode = #tpu.pipeline_mode<synchronous>, transform_indices = @transform_3, window_bounds = array<i64: 128, 128>}, {pipeline_mode = #tpu.pipeline_mode<synchronous>, transform_indices = @transform_4, window_bounds = array<i64: 1, 128>}, {transform_indices = @transform_5, window_bounds = array<i64: 1, 1, 128>}]} {
    %cst = arith.constant 0.000000e+00 : f32
    %0 = vector.broadcast %cst : f32 to vector<256x128xf32>
    %c0 = arith.constant 0 : index
    %c0_0 = arith.constant 0 : index
    %c0_1 = arith.constant 0 : index
    %c0_2 = arith.constant 0 : index
    %1 = vector.load %arg1[%c0, %c0_0, %c0_1, %c0_2] : memref<1x18x16x128xbf16, #tpu.memory_space<vmem>>, vector<1x16x16x128xbf16>
    %2 = vector.shape_cast %1 : vector<1x16x16x128xbf16> to vector<16x16x128xbf16>
    %3 = vector.shape_cast %2 : vector<16x16x128xbf16> to vector<256x128xbf16>
    %c0_3 = arith.constant 0 : index
    %c0_4 = arith.constant 0 : index
    %c0_5 = arith.constant 0 : index
    %4 = vector.load %arg2[%c0_3, %c0_4, %c0_5] : memref<3x128x128xbf16, #tpu.memory_space<vmem>>, vector<1x128x128xbf16>
    %5 = vector.shape_cast %4 : vector<1x128x128xbf16> to vector<128x128xbf16>
    %cst_6 = arith.constant dense<0.000000e+00> : vector<256x128xf32>
    %6 = tpu.matmul %3, %5, %cst_6 {dimension_numbers = #tpu.dot_dimension_numbers<[1], [0], [0], [1], [0, 0, 1, 1], [], []>} : vector<256x128xbf16>, vector<128x128xbf16>, vector<256x128xf32> -> vector<256x128xf32>
    %7 = arith.addf %0, %6 : vector<256x128xf32>
    %c0_7 = arith.constant 0 : index
    %c1 = arith.constant 1 : index
    %c0_8 = arith.constant 0 : index
    %c0_9 = arith.constant 0 : index
    %8 = vector.load %arg1[%c0_7, %c1, %c0_8, %c0_9] : memref<1x18x16x128xbf16, #tpu.memory_space<vmem>>, vector<1x16x16x128xbf16>
    %9 = vector.shape_cast %8 : vector<1x16x16x128xbf16> to vector<16x16x128xbf16>
    %10 = vector.shape_cast %9 : vector<16x16x128xbf16> to vector<256x128xbf16>
    %c1_10 = arith.constant 1 : index
    %c0_11 = arith.constant 0 : index
    %c0_12 = arith.constant 0 : index
    %11 = vector.load %arg2[%c1_10, %c0_11, %c0_12] : memref<3x128x128xbf16, #tpu.memory_space<vmem>>, vector<1x128x128xbf16>
    %12 = vector.shape_cast %11 : vector<1x128x128xbf16> to vector<128x128xbf16>
    %cst_13 = arith.constant dense<0.000000e+00> : vector<256x128xf32>
    %13 = tpu.matmul %10, %12, %cst_13 {dimension_numbers = #tpu.dot_dimension_numbers<[1], [0], [0], [1], [0, 0, 1, 1], [], []>} : vector<256x128xbf16>, vector<128x128xbf16>, vector<256x128xf32> -> vector<256x128xf32>
    %14 = arith.addf %7, %13 : vector<256x128xf32>
    %c0_14 = arith.constant 0 : index
    %c2 = arith.constant 2 : index
    %c0_15 = arith.constant 0 : index
    %c0_16 = arith.constant 0 : index
    %15 = vector.load %arg1[%c0_14, %c2, %c0_15, %c0_16] : memref<1x18x16x128xbf16, #tpu.memory_space<vmem>>, vector<1x16x16x128xbf16>
    %16 = vector.shape_cast %15 : vector<1x16x16x128xbf16> to vector<16x16x128xbf16>
    %17 = vector.shape_cast %16 : vector<16x16x128xbf16> to vector<256x128xbf16>
    %c2_17 = arith.constant 2 : index
    %c0_18 = arith.constant 0 : index
    %c0_19 = arith.constant 0 : index
    %18 = vector.load %arg2[%c2_17, %c0_18, %c0_19] : memref<3x128x128xbf16, #tpu.memory_space<vmem>>, vector<1x128x128xbf16>
    %19 = vector.shape_cast %18 : vector<1x128x128xbf16> to vector<128x128xbf16>
    %cst_20 = arith.constant dense<0.000000e+00> : vector<256x128xf32>
    %20 = tpu.matmul %17, %19, %cst_20 {dimension_numbers = #tpu.dot_dimension_numbers<[1], [0], [0], [1], [0, 0, 1, 1], [], []>} : vector<256x128xbf16>, vector<128x128xbf16>, vector<256x128xf32> -> vector<256x128xf32>
    %21 = arith.addf %14, %20 : vector<256x128xf32>
    %c0_21 = arith.constant 0 : index
    %c0_22 = arith.constant 0 : index
    %22 = vector.load %arg3[%c0_21, %c0_22] : memref<1x128xf32, #tpu.memory_space<vmem>>, vector<1x128xf32>
    %23 = vector.broadcast %22 : vector<1x128xf32> to vector<256x128xf32>
    %24 = arith.addf %21, %23 : vector<256x128xf32>
    %cst_23 = arith.constant 0.000000e+00 : f32
    %25 = vector.broadcast %cst_23 : f32 to vector<256x128xf32>
    %26 = arith.maximumf %24, %25 : vector<256x128xf32>
    %cst_24 = arith.constant dense<0.000000e+00> : vector<128xf32>
    %27 = vector.multi_reduction <add>, %26, %cst_24 [0] : vector<256x128xf32> to vector<128xf32>
    %28 = vector.shape_cast %27 : vector<128xf32> to vector<1x128xf32>
    %cst_25 = arith.constant 3.906250e-03 : f32
    %29 = vector.broadcast %cst_25 : f32 to vector<1x128xf32>
    %30 = arith.mulf %28, %29 : vector<1x128xf32>
    %31 = arith.truncf %30 : vector<1x128xf32> to vector<1x128xbf16>
    %32 = vector.shape_cast %31 : vector<1x128xbf16> to vector<1x128xbf16>
    %33 = vector.broadcast %32 : vector<1x128xbf16> to vector<8x128xbf16>
    %c0_26 = arith.constant 0 : index
    %c0_27 = arith.constant 0 : index
    %34 = vector.load %arg4[%c0_26, %c0_27] : memref<128x128xbf16, #tpu.memory_space<vmem>>, vector<128x128xbf16>
    %cst_28 = arith.constant dense<0.000000e+00> : vector<8x128xf32>
    %35 = tpu.matmul %33, %34, %cst_28 {dimension_numbers = #tpu.dot_dimension_numbers<[1], [0], [0], [1], [0, 0, 1, 1], [], []>} : vector<8x128xbf16>, vector<128x128xbf16>, vector<8x128xf32> -> vector<8x128xf32>
    %36 = vector.extract_strided_slice %35 {offsets = [0, 0], sizes = [1, 128], strides = [1, 1]} : vector<8x128xf32> to vector<1x128xf32>
    %c0_29 = arith.constant 0 : index
    %c0_30 = arith.constant 0 : index
    %37 = vector.load %arg5[%c0_29, %c0_30] : memref<1x128xf32, #tpu.memory_space<vmem>>, vector<1x128xf32>
    %38 = arith.addf %36, %37 : vector<1x128xf32>
    %39 = tpu.iota {dimensions = array<i32: 1>} : vector<1x128xi32>
    %c10_i32 = arith.constant 10 : i32
    %40 = vector.broadcast %c10_i32 : i32 to vector<1x128xi32>
    %41 = arith.cmpi slt, %39, %40 : vector<1x128xi32>
    %cst_31 = arith.constant -1.000000e+30 : f32
    %42 = vector.broadcast %cst_31 : f32 to vector<1x128xf32>
    %43 = arith.select %41, %38, %42 : vector<1x128xi1>, vector<1x128xf32>
    %cst_32 = arith.constant dense<0xFF800000> : vector<1xf32>
    %44 = vector.multi_reduction <maximumf>, %43, %cst_32 [1] : vector<1x128xf32> to vector<1xf32>
    %45 = vector.shape_cast %44 : vector<1xf32> to vector<1x1xf32>
    %46 = vector.broadcast %45 : vector<1x1xf32> to vector<1x128xf32>
    %47 = arith.subf %43, %46 : vector<1x128xf32>
    %48 = math.exp %47 : vector<1x128xf32>
    %cst_33 = arith.constant dense<0.000000e+00> : vector<1xf32>
    %49 = vector.multi_reduction <add>, %48, %cst_33 [1] : vector<1x128xf32> to vector<1xf32>
    %50 = vector.shape_cast %49 : vector<1xf32> to vector<1x1xf32>
    %51 = math.log %50 : vector<1x1xf32>
    %52 = vector.broadcast %51 : vector<1x1xf32> to vector<1x128xf32>
    %53 = arith.subf %47, %52 : vector<1x128xf32>
    %54 = vector.shape_cast %53 : vector<1x128xf32> to vector<1x1x128xf32>
    %c0_34 = arith.constant 0 : index
    %c0_35 = arith.constant 0 : index
    %c0_36 = arith.constant 0 : index
    %55 = vector.load %arg6[%c0_34, %c0_35, %c0_36] : memref<1x1x128xf32, #tpu.memory_space<vmem>>, vector<1x1x128xf32>
    tpu.vector_store %arg6[%c0_34, %c0_35, %c0_36], %54 {strides = array<i32>} : memref<1x1x128xf32, #tpu.memory_space<vmem>>, vector<1x1x128xf32>,
    return
  }
  func.func @transform_0(%arg0: i32) -> (i32, i32, i32, i32) {
    %c0_i32 = arith.constant 0 : i32
    %c0_i32_0 = arith.constant 0 : i32
    %c0_i32_1 = arith.constant 0 : i32
    %c0_i32_2 = arith.constant 0 : i32
    return %arg0, %c0_i32, %c0_i32_0, %c0_i32_1 : i32, i32, i32, i32
  }
  func.func @transform_1(%arg0: i32) -> (i32, i32, i32) {
    %c0_i32 = arith.constant 0 : i32
    %c0_i32_0 = arith.constant 0 : i32
    %c0_i32_1 = arith.constant 0 : i32
    %c0_i32_2 = arith.constant 0 : i32
    return %c0_i32, %c0_i32_0, %c0_i32_1 : i32, i32, i32
  }
  func.func @transform_2(%arg0: i32) -> (i32, i32) {
    %c0_i32 = arith.constant 0 : i32
    %c0_i32_0 = arith.constant 0 : i32
    %c0_i32_1 = arith.constant 0 : i32
    return %c0_i32, %c0_i32_0 : i32, i32
  }
  func.func @transform_3(%arg0: i32) -> (i32, i32) {
    %c0_i32 = arith.constant 0 : i32
    %c0_i32_0 = arith.constant 0 : i32
    %c0_i32_1 = arith.constant 0 : i32
    return %c0_i32, %c0_i32_0 : i32, i32
  }
  func.func @transform_4(%arg0: i32) -> (i32, i32) {
    %c0_i32 = arith.constant 0 : i32
    %c0_i32_0 = arith.constant 0 : i32
    %c0_i32_1 = arith.constant 0 : i32
    return %c0_i32, %c0_i32_0 : i32, i32
  }
  func.func @transform_5(%arg0: i32) -> (i32, i32, i32) {
    %c0_i32 = arith.constant 0 : i32
    %c0_i32_0 = arith.constant 0 : i32
    %c0_i32_1 = arith.constant 0 : i32
    return %arg0, %c0_i32, %c0_i32_0 : i32, i32, i32
  }
}

</mosaic_0001>

<bundles_post_ra>
// kernel: model_forward.1
= control target key start
LH: loop header
LB: loop body
LE: loop exit
PB: predicated region body
PF: predicated region fallthrough
CT: control target
= control target key end

     0   :  { %10 = vsyncpa [#allocation3], 0  ;;  %s2379_s0 = inlined_call_operand.vmem [shape: bf16[2,18,16,128], index: 0, kind: input, shape index: {}]   ;;  %s2380_s1 = inlined_call_operand.vmem [shape: bf16[3,128,128], index: 1, kind: input, shape index: {}]   ;;  %s2381_s2 = inlined_call_operand.vmem [shape: f32[1,128], index: 2, kind: input, shape index: {}]   ;;  %s2382_s3 = inlined_call_operand.vmem [shape: bf16[128,128], index: 3, kind: input, shape index: {}]   ;;  %s2383_s4 = inlined_call_operand.vmem [shape: f32[1,128], index: 4, kind: input, shape index: {}]   ;;  %s2384_s5 = inlined_call_operand.hbm [shape: f32[2,1,128], index: 5, kind: output, shape index: {}]  }
   0x1   :  { %12 = vsyncpa [#allocation3 + $0x1], 0  ;;  %s2039_s18 = smov 0   ;;  %s2041_s19 = smov 0  }
   0x2   :  { %s2043_s20 = smov 0   ;;  %s2045_s21 = smov 0  }
   0x3 LB: > { %s2060_s22 = sadd.s32 4294967295, %s2007_s21   ;;  %s1373_s23 = sadd.s32 4294967294, %s2007_s21   ;;  %s2007_s21 = sphi %s2045_s21, %s2390_s21   ;;  %s2003_s20 = sphi %s2043_s20, %s2389_s20   ;;  %s1999_s19 = sphi %s2041_s19, %s2388_s19   ;;  %s1995_s18 = sphi %s2039_s18, %s2387_s18  }
   0x4   : > { %s2064_s24 = sadd.s32 1, %s2007_s21   ;;  %s135_s25 = sadd.s32 1, %s2003_s20 }
   0x5   : > { %s132_s26 = ssub.s32 %s2007_s21, %s2064_s24  ;;  %p145_p0 = scmp.ne.s32.totalorder %s2003_s20, %s1999_s19 }
   0x6   : > { %p133_p1 = scmp.eq.s32.totalorder %s132_s26, 0  ;;  %p146_p2 = scmp.eq.s32.totalorder %s2060_s22, 1 }
   0x7   : > { %p151_p3 = scmp.ne.s32.totalorder %s1999_s19, %s1995_s18  ;;  %p152_p4 = scmp.eq.s32.totalorder %s1373_s23, 1 }
   0x8   : > { %s2075_s27 = scalar_select %p133_p1, %s2003_s20, %s135_s25  }
   0x9   : > { %p2077_p5 = por %p146_p2, %p145_p0  ;;  %p2081_p6 = por %p152_p4, %p151_p3 }
   0xa   : > { %p1376_p7 = scmp.ge.s32.totalorder %s2007_s21, 1  ;;  %p190_p8 = scmp.lt.s32.totalorder %s2007_s21, 3 }
   0xc   : > { %p191_p9 = pnand %p1376_p7, %p190_p8 }
   0xd   : > { %p217_p10 = scmp.lt.s32.totalorder (!%p191_p9), %s2060_s22, 1  ;;  %s215_s14 = sand.u32 (!%p191_p9), 1, %s1999_s19  }
   0xe   : > { %194 = sbr.rel (%p191_p9) target bundleno = 815 (0x32f), region = 40  ;;  %s1314_s17 = scalar_lea.hbm (!%p191_p9), %s2384_s5, %s2060_s22 }
   0xf   : > { %s216_s23 = scalar_lea.vmem (!%p191_p9), [#allocation2], %s215_s14  ;;  %s1318_s26 = sshll.u32 (!%p191_p9), %s1314_s17, 4  ;;  %s1319_s26 = int_to_ptr.hbm [resolvable:$true] %s1318_s26 }
  0x10   : > { %s1316_s25 = sshll.u32 (!%p191_p9), %s216_s23, 4  ;;  %s1959_s6 = sshra.s32 (!%p191_p9), %s1319_s26, 4  ;;  %s1317_s25 = int_to_ptr.vmem [resolvable:$true] %s1316_s25  ;;  %s1960_s6 = int_to_ptr.hbm [resolvable:$true] %s1959_s6 }
  0x11   : > { %s1961_s7 = scalar_lea.hbm (!%p191_p9), %s1960_s6, 1  ;;  %p1966_p0 = scmp.lt.s32.totalorder (!%p191_p9), %s1960_s6, %s2384_s5 }
  0x12   : > { %p1962_p11 = scmp.ne.s32.totalorder (!%p191_p9), %s1960_s6, %s1961_s7 }
  0x13   : > { %v1843_v0 = vld [vmem:[%s2380_s1 + $0x78] sm:$0xff]  ;;  %v1842_v3 = vld [vmem:[%s2380_s1 + $0x70] sm:$0xff]  ;;  %v1841_v6 = vld [vmem:[%s2380_s1 + $0x68] sm:$0xff]  ;;  %s218_s30 = scalar_select %p217_p10, %s2060_s22, 1  ;;  %vm1291_vm1 = vcmask 1040384  }
  0x14   : > { %v1819_v1 = vld [vmem:[%s2380_s1 + $0x38] sm:$0xff]  ;;  %464 = vmatpush.bf16.msra.mxu0 %v1843_v0  ;;  %1876 = vmatpush.bf16.msra.mxu3 %v1843_v0  ;;  %v1818_v4 = vld [vmem:[%s2380_s1 + $0x30] sm:$0xff]  ;;  %v1817_v7 = vld [vmem:[%s2380_s1 + $0x28] sm:$0xff]  ;;  %p1963_p12 = pnand %p1962_p11, %p2077_p5  ;;  %s1965_s22 = scalar_lea.hbm %s2384_s5, 2 }
  0x15   : > { %v2096_v2 = vld [vmem:[%s2380_s1 + $0xb8] sm:$0xff]  ;;  %697 = vmatpush.bf16.msra.mxu1 %v1819_v1  ;;  %v2108_v5 = vld [vmem:[%s2380_s1 + $0xb0] sm:$0xff]  ;;  %v2120_v8 = vld [vmem:[%s2380_s1 + $0xa8] sm:$0xff]  ;;  %s1900_s12 = smul.u32 144, %s218_s30  ;;  %p1967_p1 = scmp.lt.s32.totalorder %s1965_s22, %s1961_s7 }
  0x16   : > { %980 = vmatpush.bf16.msra.mxu2 %v2096_v2  ;;  %v1840_v9 = vld [vmem:[%s2380_s1 + $0x60] sm:$0xff]  ;;  %v1839_v12 = vld [vmem:[%s2380_s1 + $0x58] sm:$0xff]  ;;  %v1838_v15 = vld [vmem:[%s2380_s1 + $0x50] sm:$0xff]  ;;  %p1964_p13 = pneg %p1963_p12 }
  0x17   : > { %v1816_v10 = vld [vmem:[%s2380_s1 + $0x20] sm:$0xff]  ;;  %v1815_v13 = vld [vmem:[%s2380_s1 + $0x18] sm:$0xff]  ;;  %v1814_v16 = vld [vmem:[%s2380_s1 + $0x10] sm:$0xff]  ;;  %s2176_s30 = scalar_lea.vmem %s2379_s0, %s1900_s12  ;;  %p1968_p2 = por %p1967_p1, %p1966_p0 }
  0x18   : > { %465 = vmatpush.bf16.msra.mxu0 %v1842_v3  ;;  %1877 = vmatpush.bf16.msra.mxu3 %v1842_v3  ;;  %v2132_v11 = vld [vmem:[%s2380_s1 + $0xa0] sm:$0xff]  ;;  %v2145_v14 = vld [vmem:[%s2380_s1 + $0x98] sm:$0xff]  ;;  %v2158_v17 = vld [vmem:[%s2380_s1 + $0x90] sm:$0xff] }
  0x19   : > { %698 = vmatpush.bf16.msra.mxu1 %v1818_v4  ;;  %v1837_v18 = vld [vmem:[%s2380_s1 + $0x48] sm:$0xff]  ;;  %v1836_v21 = vld [vmem:[%s2380_s1 + $0x40] sm:$0xff]  ;;  %v1833_v25 = vld [vmem:[%s2176_s30 + $0x70] sm:$0xff]  ;;  %p1969_p3 = pnand %p1968_p2, %p1964_p13 }
  0x1a   : > { %981 = vmatpush.bf16.msra.mxu2 %v2108_v5  ;;  %v1813_v19 = vld [vmem:[%s2380_s1 + $0x8] sm:$0xff]  ;;  %v1812_v22 = vld [vmem:[%s2380_s1] sm:$0xff]  ;;  %v1844_v27 = vld [vmem:[%s2176_s30 + $0x10] sm:$0xff] }
  0x1b   : > { %v1861_v20 = vld [vmem:[%s2380_s1 + $0x88] sm:$0xff]  ;;  %v1860_v23 = vld [vmem:[%s2380_s1 + $0x80] sm:$0xff]  ;;  %v1821_v28 = vld [vmem:[%s2176_s30 + $0x10] sm:$0xff] }
  0x1c   : > { %466 = vmatpush.bf16.msra.mxu0 %v1841_v6  ;;  %1878 = vmatpush.bf16.msra.mxu3 %v1841_v6  ;;  %v1820_v24 = vld [vmem:[%s2176_s30 + $0x8] sm:$0xff]  ;;  %v1796_v26 = vld [vmem:[%s2176_s30] sm:$0xff]  ;;  %v1834_v29 = vld [vmem:[%s2176_s30 + $0x78] sm:$0xff] }
  0x1d   : > { %699 = vmatpush.bf16.msra.mxu1 %v1817_v7  ;;  %v1797_v30 = vld [vmem:[%s2176_s30 + $0x8] sm:$0xff]  ;;  %v1845_v31 = vld [vmem:[%s2176_s30 + $0x18] sm:$0xff]  ;;  %v1835_v33 = vld [vmem:[%s2176_s30 + $0x80] sm:$0xff] }
  0x1e   : > { %982 = vmatpush.bf16.msra.mxu2 %v2120_v8  ;;  %v1822_v32 = vld [vmem:[%s2176_s30 + $0x18] sm:$0xff]  ;;  %v1798_v34 = vld [vmem:[%s2176_s30 + $0x10] sm:$0xff]  ;;  %v1846_v35 = vld [vmem:[%s2176_s30 + $0x20] sm:$0xff] }
  0x1f   : > { %v1823_v36 = vld [vmem:[%s2176_s30 + $0x20] sm:$0xff]  ;;  %v1809_v37 = vld [vmem:[%s2176_s30 + $0x68] sm:$0xff]  ;;  %v1799_v38 = vld [vmem:[%s2176_s30 + $0x18] sm:$0xff] }
  0x20   : > { %467 = vmatpush.bf16.msra.mxu0 %v1840_v9  ;;  %1879 = vmatpush.bf16.msra.mxu3 %v1840_v9  ;;  %v1847_v39 = vld [vmem:[%s2176_s30 + $0x28] sm:$0xff]  ;;  %v1810_v41 = vld [vmem:[%s2176_s30 + $0x70] sm:$0xff]  ;;  %v1800_v42 = vld [vmem:[%s2176_s30 + $0x20] sm:$0xff] }
  0x21   : > { %700 = vmatpush.bf16.msra.mxu1 %v1816_v10  ;;  %v1824_v40 = vld [vmem:[%s2176_s30 + $0x28] sm:$0xff]  ;;  %v1848_v43 = vld [vmem:[%s2176_s30 + $0x30] sm:$0xff]  ;;  %v1811_v45 = vld [vmem:[%s2176_s30 + $0x78] sm:$0xff] }
  0x22   : > { %983 = vmatpush.bf16.msra.mxu2 %v2132_v11  ;;  %v1825_v44 = vld [vmem:[%s2176_s30 + $0x30] sm:$0xff]  ;;  %v1801_v46 = vld [vmem:[%s2176_s30 + $0x28] sm:$0xff]  ;;  %v1849_v47 = vld [vmem:[%s2176_s30 + $0x38] sm:$0xff] }
  0x23   : > { %v1826_v48 = vld [vmem:[%s2176_s30 + $0x38] sm:$0xff]  ;;  %v1802_v50 = vld [vmem:[%s2176_s30 + $0x30] sm:$0xff]  ;;  %v1850_v51 = vld [vmem:[%s2176_s30 + $0x40] sm:$0xff] }
  0x24   : > { %468 = vmatpush.bf16.msra.mxu0 %v1839_v12  ;;  %1880 = vmatpush.bf16.msra.mxu3 %v1839_v12  ;;  %v1857_v49 = vld [vmem:[%s2176_s30 + $0x78] sm:$0xff]  ;;  %v1827_v52 = vld [vmem:[%s2176_s30 + $0x40] sm:$0xff]  ;;  %v1851_v55 = vld [vmem:[%s2176_s30 + $0x48] sm:$0xff] }
  0x25   : > { %701 = vmatpush.bf16.msra.mxu1 %v1815_v13  ;;  %v1858_v53 = vld [vmem:[%s2176_s30 + $0x80] sm:$0xff]  ;;  %v1803_v54 = vld [vmem:[%s2176_s30 + $0x38] sm:$0xff]  ;;  %v1828_v56 = vld [vmem:[%s2176_s30 + $0x48] sm:$0xff] }
  0x26   : > { %984 = vmatpush.bf16.msra.mxu2 %v2145_v14  ;;  %v1859_v57 = vld [vmem:[%s2176_s30 + $0x88] sm:$0xff]  ;;  %v1804_v59 = vld [vmem:[%s2176_s30 + $0x40] sm:$0xff]  ;;  %v1852_v60 = vld [vmem:[%s2176_s30 + $0x50] sm:$0xff] }
  0x27   : > { %v1805_v12 = vld [vmem:[%s2176_s30 + $0x48] sm:$0xff] }
  0x28   : > { %469 = vmatpush.bf16.msra.mxu0 %v1838_v15  ;;  %1881 = vmatpush.bf16.msra.mxu3 %v1838_v15 }
  0x29   : > { %702 = vmatpush.bf16.msra.mxu1 %v1814_v16 }
  0x2a   : > { %985 = vmatpush.bf16.msra.mxu2 %v2158_v17 }
  0x2c   : > { %470 = vmatpush.bf16.msra.mxu0 %v1837_v18  ;;  %1882 = vmatpush.bf16.msra.mxu3 %v1837_v18 }
  0x2d   : > { %703 = vmatpush.bf16.msra.mxu1 %v1813_v19 }
  0x2e   : > { %986 = vmatpush.bf16.msra.mxu2 %v1861_v20 }
  0x30   : > { %471 = vmatpush.bf16.msra.mxu0 %v1836_v21  ;;  %1883 = vmatpush.bf16.msra.mxu3 %v1836_v21 }
  0x31   : > { %704 = vmatpush.bf16.msra.mxu1 %v1812_v22 }
  0x32   : > { %987 = vmatpush.bf16.msra.mxu2 %v1860_v23 }
  0x33   : > { %472 = vmatmul.bf16.vlgmr.msra.gmra.mxu0 %v1820_v24  ;;  %537 = vmatmul.bf16.vlgmr.msra.gmra.mxu3 %v1833_v25 }
  0x34   : > { %1884 = vmatpush.bf16.msrb.mxu3 %v1819_v1  ;;  %705 = vmatmul.bf16.vlgmr.msra.gmra.mxu1 %v1796_v26 }
  0x35   : > { %988 = vmatmul.bf16.vlgmr.msra.gmra.mxu2 %v1844_v27 }
  0x38   : > { %1885 = vmatpush.bf16.msrb.mxu3 %v1818_v4 }
  0x3c   : > { %1886 = vmatpush.bf16.msrb.mxu3 %v1817_v7 }
  0x40   : > { %1887 = vmatpush.bf16.msrb.mxu3 %v1816_v10 }
  0x43   : > { %477 = vmatmul.bf16.gmra.mxu0 %v1821_v28  ;;  %542 = vmatmul.bf16.gmra.mxu3 %v1834_v29 }
  0x44   : > { %1888 = vmatpush.bf16.msrb.mxu3 %v1815_v13  ;;  %710 = vmatmul.bf16.gmra.mxu1 %v1797_v30  ;;  %v1853_v13 = vld [vmem:[%s2176_s30 + $0x58] sm:$0xff] }
  0x45   : > { %993 = vmatmul.bf16.gmra.mxu2 %v1845_v31  ;;  %v1830_v31 = vld [vmem:[%s2176_s30 + $0x58] sm:$0xff] }
  0x48   : > { %1889 = vmatpush.bf16.msrb.mxu3 %v1814_v16 }
  0x4c   : > { %1890 = vmatpush.bf16.msrb.mxu3 %v1813_v19 }
  0x50   : > { %1891 = vmatpush.bf16.msrb.mxu3 %v1812_v22 }
  0x53   : > { %482 = vmatmul.bf16.gmra.mxu0 %v1822_v32  ;;  %547 = vmatmul.bf16.gmra.mxu3 %v1835_v33 }
  0x54   : > { %1892 = vmatpush.bf16.msra.mxu3 %v2096_v2  ;;  %715 = vmatmul.bf16.gmra.mxu1 %v1798_v34  ;;  %v1806_v34 = vld [vmem:[%s2176_s30 + $0x50] sm:$0xff] }
  0x55   : > { %998 = vmatmul.bf16.gmra.mxu2 %v1846_v35  ;;  %v1854_v35 = vld [vmem:[%s2176_s30 + $0x60] sm:$0xff] }
  0x58   : > { %1893 = vmatpush.bf16.msra.mxu3 %v2108_v5  ;;  %v2231_v5 = vld [vmem:[%s2381_s2] ss:$0 sm:$0xff] }
  0x5c   : > { %1894 = vmatpush.bf16.msra.mxu3 %v2120_v8  ;;  %v1829_v8 = vld [vmem:[%s2176_s30 + $0x50] sm:$0xff] }
  0x60   : > { %1895 = vmatpush.bf16.msra.mxu3 %v2132_v11 }
  0x63   : > { %487 = vmatmul.bf16.gmra.mxu0 %v1823_v36  ;;  %770 = vmatmul.bf16.vlgmr.msrb.gmra.mxu3 %v1809_v37 }
  0x64   : > { %1896 = vmatpush.bf16.msra.mxu3 %v2145_v14  ;;  %720 = vmatmul.bf16.gmra.mxu1 %v1799_v38 }
  0x65   : > { %1003 = vmatmul.bf16.gmra.mxu2 %v1847_v39 }
  0x68   : > { %1897 = vmatpush.bf16.msra.mxu3 %v2158_v17 }
  0x6c   : > { %1898 = vmatpush.bf16.msra.mxu3 %v1861_v20 }
  0x70   : > { %1899 = vmatpush.bf16.msra.mxu3 %v1860_v23 }
  0x73   : > { %492 = vmatmul.bf16.gmra.mxu0 %v1824_v40  ;;  %775 = vmatmul.bf16.gmra.mxu3 %v1810_v41 }
  0x74   : > { %725 = vmatmul.bf16.gmra.mxu1 %v1800_v42 }
  0x75   : > { %1008 = vmatmul.bf16.gmra.mxu2 %v1848_v43 }
  0x83   : > { %497 = vmatmul.bf16.gmra.mxu0 %v1825_v44  ;;  %780 = vmatmul.bf16.gmra.mxu3 %v1811_v45 }
  0x84   : > { %730 = vmatmul.bf16.gmra.mxu1 %v1801_v46 }
  0x85   : > { %1013 = vmatmul.bf16.gmra.mxu2 %v1849_v47 }
  0x93   : > { %502 = vmatmul.bf16.gmra.mxu0 %v1826_v48  ;;  %1053 = vmatmul.bf16.vlgmr.msra.gmra.mxu3 %v1857_v49 }
  0x94   : > { %735 = vmatmul.bf16.gmra.mxu1 %v1802_v50 }
  0x95   : > { %1018 = vmatmul.bf16.gmra.mxu2 %v1850_v51 }
  0xa3   : > { %507 = vmatmul.bf16.gmra.mxu0 %v1827_v52  ;;  %1058 = vmatmul.bf16.gmra.mxu3 %v1858_v53  ;;  %v1831_v52 = vld [vmem:[%s2176_s30 + $0x60] sm:$0xff] }
  0xa4   : > { %740 = vmatmul.bf16.gmra.mxu1 %v1803_v54 }
  0xa5   : > { %1023 = vmatmul.bf16.gmra.mxu2 %v1851_v55  ;;  %v1807_v55 = vld [vmem:[%s2176_s30 + $0x58] sm:$0xff] }
  0xb0   : > { %v473_v58 = vpop.f32.mrf.mxu0 }
  0xb1   : > { %v706_v61 = vpop.f32.mrf.mxu1 }
  0xb2   : > { %v707_v62 = vadd.f32 %v706_v61, %v473_v58 }
  0xb3   : > { %512 = vmatmul.bf16.gmra.mxu0 %v1828_v56  ;;  %1063 = vmatmul.bf16.gmra.mxu3 %v1859_v57  ;;  %v1855_v56 = vld [vmem:[%s2176_s30 + $0x68] sm:$0xff] }
  0xb4   : > { %745 = vmatmul.bf16.gmra.mxu1 %v1804_v59 }
  0xb5   : > { %1028 = vmatmul.bf16.gmra.mxu2 %v1852_v60 }
  0xb6   : > { %v2226_v63 = vpop.f32.mrf.mxu3 }
  0xb8   : > { %v989_v0 = vpop.f32.mrf.mxu2  ;;  %v475_v2 = vpop.f32.mrf.mxu0 }
  0xb9   : > { %v1069_v1 = vadd.f32 %v989_v0, %v707_v62  ;;  %v708_v3 = vpop.f32.mrf.mxu1 }
  0xba   : > { %v709_v4 = vadd.f32 %v708_v3, %v475_v2 }
  0xbb   : > { %v1105_v9 = vadd.f32 %v2231_v5, %v1069_v1 }
  0xbd   : > { %v1137_v17 = vmax.f32 %v1105_v9, 0.0 }
  0xbe   : > { %v2233_v6 = vpop.f32.mrf.mxu3 }
  0xc0   : > { %v991_v7 = vpop.f32.mrf.mxu2  ;;  %v478_v11 = vpop.f32.mrf.mxu0 }
  0xc1   : > { %v1070_v10 = vadd.f32 %v991_v7, %v709_v4  ;;  %v711_v14 = vpop.f32.mrf.mxu1 }
  0xc2   : > { %v712_v16 = vadd.f32 %v711_v14, %v478_v11  ;;  %v1832_v14 = vld [vmem:[%s2176_s30 + $0x68] sm:$0xff] }
  0xc3   : > { %v1106_v15 = vadd.f32 %v2231_v5, %v1070_v10  ;;  %517 = vmatmul.bf16.gmra.mxu0 %v1829_v8 }
  0xc4   : > { %750 = vmatmul.bf16.gmra.mxu1 %v1805_v12 }
  0xc5   : > { %v1138_v18 = vmax.f32 %v1106_v15, 0.0  ;;  %1033 = vmatmul.bf16.gmra.mxu2 %v1853_v13 }
  0xc6   : > { %v2240_v20 = vpop.f32.mrf.mxu3 }
  0xc7   : > { %v1169_v19 = vadd.f32 %v1138_v18, %v1137_v17  ;;  %v1856_v17 = vld [vmem:[%s2176_s30 + $0x70] sm:$0xff] }
  0xc8   : > { %v994_v21 = vpop.f32.mrf.mxu2  ;;  %v480_v23 = vpop.f32.mrf.mxu0 }
  0xc9   : > { %v1071_v22 = vadd.f32 %v994_v21, %v712_v16  ;;  %v713_v24 = vpop.f32.mrf.mxu1 }
  0xca   : > { %v714_v26 = vadd.f32 %v713_v24, %v480_v23 }
  0xcb   : > { %v1107_v25 = vadd.f32 %v2231_v5, %v1071_v22 }
  0xcd   : > { %v1139_v27 = vmax.f32 %v1107_v25, 0.0 }
  0xce   : > { %v2243_v29 = vpop.f32.mrf.mxu3 }
  0xcf   : > { %v1170_v28 = vadd.f32 %v1169_v19, %v1139_v27 }
  0xd0   : > { %v996_v30 = vpop.f32.mrf.mxu2  ;;  %v483_v33 = vpop.f32.mrf.mxu0 }
  0xd1   : > { %v1072_v32 = vadd.f32 %v996_v30, %v714_v26  ;;  %v716_v36 = vpop.f32.mrf.mxu1 }
  0xd2   : > { %v717_v38 = vadd.f32 %v716_v36, %v483_v33 }
  0xd3   : > { %v1108_v37 = vadd.f32 %v2231_v5, %v1072_v32  ;;  %522 = vmatmul.bf16.gmra.mxu0 %v1830_v31 }
  0xd4   : > { %755 = vmatmul.bf16.gmra.mxu1 %v1806_v34 }
  0xd5   : > { %v1140_v39 = vmax.f32 %v1108_v37, 0.0  ;;  %1038 = vmatmul.bf16.gmra.mxu2 %v1854_v35 }
  0xd6   : > { %v2249_v41 = vpop.f32.mrf.mxu3 }
  0xd7   : > { %v1171_v40 = vadd.f32 %v1170_v28, %v1140_v39 }
  0xd8   : > { %v999_v42 = vpop.f32.mrf.mxu2  ;;  %v485_v44 = vpop.f32.mrf.mxu0 }
  0xd9   : > { %v1073_v43 = vadd.f32 %v999_v42, %v717_v38  ;;  %v718_v45 = vpop.f32.mrf.mxu1 }
  0xda   : > { %v719_v47 = vadd.f32 %v718_v45, %v485_v44 }
  0xdb   : > { %v1109_v46 = vadd.f32 %v2231_v5, %v1073_v43 }
  0xdd   : > { %v1141_v48 = vmax.f32 %v1109_v46, 0.0 }
  0xde   : > { %v2252_v50 = vpop.f32.mrf.mxu3 }
  0xdf   : > { %v1172_v49 = vadd.f32 %v1171_v40, %v1141_v48 }
  0xe0   : > { %v1001_v51 = vpop.f32.mrf.mxu2  ;;  %v488_v54 = vpop.f32.mrf.mxu0 }
  0xe1   : > { %v1074_v53 = vadd.f32 %v1001_v51, %v719_v47  ;;  %v721_v57 = vpop.f32.mrf.mxu1 }
  0xe2   : > { %v722_v59 = vadd.f32 %v721_v57, %v488_v54 }
  0xe3   : > { %v1110_v58 = vadd.f32 %v2231_v5, %v1074_v53  ;;  %527 = vmatmul.bf16.gmra.mxu0 %v1831_v52 }
  0xe4   : > { %760 = vmatmul.bf16.gmra.mxu1 %v1807_v55 }
  0xe5   : > { %v1142_v60 = vmax.f32 %v1110_v58, 0.0  ;;  %1043 = vmatmul.bf16.gmra.mxu2 %v1855_v56 }
  0xe6   : > { %v771_v62 = vpop.f32.mrf.mxu3 }
  0xe7   : > { %v1173_v61 = vadd.f32 %v1172_v49, %v1142_v60  ;;  %v2259_v0 = vadd.f32 %v771_v62, %v2226_v63  ;;  %v1808_v63 = vld [vmem:[%s2176_s30 + $0x60] sm:$0xff]  ;;  %s1306_s30 = scalar_lea.sflag [#allocation3], %s215_s14 }
  0xe8   : > { %v1004_v1 = vpop.f32.mrf.mxu2  ;;  %v490_v3 = vpop.f32.mrf.mxu0 }
  0xe9   : > { %v1075_v2 = vadd.f32 %v1004_v1, %v722_v59  ;;  %v723_v4 = vpop.f32.mrf.mxu1 }
  0xea   : > { %v724_v8 = vadd.f32 %v723_v4, %v490_v3 }
  0xeb   : > { %v1111_v7 = vadd.f32 %v2231_v5, %v1075_v2 }
  0xed   : > { %v1143_v9 = vmax.f32 %v1111_v7, 0.0 }
  0xee   : > { %v773_v11 = vpop.f32.mrf.mxu3 }
  0xef   : > { %v1174_v10 = vadd.f32 %v1173_v61, %v1143_v9  ;;  %v2263_v12 = vadd.f32 %v773_v11, %v2233_v6 }
  0xf0   : > { %v1006_v13 = vpop.f32.mrf.mxu2  ;;  %v493_v16 = vpop.f32.mrf.mxu0 }
  0xf1   : > { %v1076_v15 = vadd.f32 %v1006_v13, %v724_v8  ;;  %v726_v18 = vpop.f32.mrf.mxu1 }
  0xf2   : > { %v727_v21 = vadd.f32 %v726_v18, %v493_v16 }
  0xf3   : > { %v1112_v19 = vadd.f32 %v2231_v5, %v1076_v15  ;;  %532 = vmatmul.bf16.gmra.mxu0 %v1832_v14 }
  0xf4   : > { %765 = vmatmul.bf16.gmra.mxu1 %v1808_v63 }
  0xf5   : > { %v1144_v22 = vmax.f32 %v1112_v19, 0.0  ;;  %1048 = vmatmul.bf16.gmra.mxu2 %v1856_v17 }
  0xf6   : > { %v776_v24 = vpop.f32.mrf.mxu3 }
  0xf7   : > { %v1175_v23 = vadd.f32 %v1174_v10, %v1144_v22  ;;  %v2270_v25 = vadd.f32 %v776_v24, %v2240_v20 }
  0xf8   : > { %v1009_v6 = vpop.f32.mrf.mxu2  ;;  %v495_v27 = vpop.f32.mrf.mxu0 }
  0xf9   : > { %v1077_v26 = vadd.f32 %v1009_v6, %v727_v21  ;;  %v728_v28 = vpop.f32.mrf.mxu1 }
  0xfa   : > { %v729_v31 = vadd.f32 %v728_v28, %v495_v27 }
  0xfb   : > { %v1113_v30 = vadd.f32 %v2231_v5, %v1077_v26 }
  0xfd   : > { %v1145_v32 = vmax.f32 %v1113_v30, 0.0 }
  0xfe   : > { %v2279_v26 = vpop.f32.mrf.mxu3 }
  0xff   : > { %v1176_v33 = vadd.f32 %v1175_v23, %v1145_v32 }
 0x100   : > { %v1011_v34 = vpop.f32.mrf.mxu2  ;;  %v498_v36 = vpop.f32.mrf.mxu0 }
 0x101   : > { %v1078_v35 = vadd.f32 %v1011_v34, %v729_v31  ;;  %v731_v37 = vpop.f32.mrf.mxu1 }
 0x102   : > { %v732_v39 = vadd.f32 %v731_v37, %v498_v36 }
 0x103   : > { %v1114_v38 = vadd.f32 %v2231_v5, %v1078_v35 }
 0x105   : > { %v1146_v40 = vmax.f32 %v1114_v38, 0.0 }
 0x106   : > { %v2281_v31 = vpop.f32.mrf.mxu3 }
 0x107   : > { %v1177_v42 = vadd.f32 %v1176_v33, %v1146_v40 }
 0x108   : > { %v1014_v20 = vpop.f32.mrf.mxu2  ;;  %v500_v44 = vpop.f32.mrf.mxu0 }
 0x109   : > { %v1079_v43 = vadd.f32 %v1014_v20, %v732_v39  ;;  %v733_v45 = vpop.f32.mrf.mxu1 }
 0x10a   : > { %v734_v47 = vadd.f32 %v733_v45, %v500_v44 }
 0x10b   : > { %v1115_v46 = vadd.f32 %v2231_v5, %v1079_v43  ;;  %v1875_v43 = vld [vmem:[%s2382_s3 + $0x38] sm:$0xff] }
 0x10c   : > { %1272 = vmatpush.bf16.msrb.mxu3 %v1875_v43 }
 0x10d   : > { %v1147_v48 = vmax.f32 %v1115_v46, 0.0 }
 0x10e   : > { %v2283_v36 = vpop.f32.mrf.mxu3 }
 0x10f   : > { %v1178_v49 = vadd.f32 %v1177_v42, %v1147_v48  ;;  %v1874_v48 = vld [vmem:[%s2382_s3 + $0x30] sm:$0xff] }
 0x110   : > { %v1016_v51 = vpop.f32.mrf.mxu2  ;;  %v503_v53 = vpop.f32.mrf.mxu0  ;;  %1273 = vmatpush.bf16.msrb.mxu3 %v1874_v48 }
 0x111   : > { %v1080_v52 = vadd.f32 %v1016_v51, %v734_v47  ;;  %v736_v54 = vpop.f32.mrf.mxu1 }
 0x112   : > { %v737_v56 = vadd.f32 %v736_v54, %v503_v53 }
 0x113   : > { %v1116_v55 = vadd.f32 %v2231_v5, %v1080_v52 }
 0x115   : > { %v1148_v57 = vmax.f32 %v1116_v55, 0.0 }
 0x116   : > { %v2285_v20 = vpop.f32.mrf.mxu3 }
 0x117   : > { %v1179_v58 = vadd.f32 %v1178_v49, %v1148_v57 }
 0x118   : > { %v1019_v59 = vpop.f32.mrf.mxu2  ;;  %v505_v61 = vpop.f32.mrf.mxu0 }
 0x119   : > { %v1081_v60 = vadd.f32 %v1019_v59, %v737_v56  ;;  %v738_v62 = vpop.f32.mrf.mxu1 }
 0x11a   : > { %v739_v2 = vadd.f32 %v738_v62, %v505_v61 }
 0x11b   : > { %v1117_v1 = vadd.f32 %v2231_v5, %v1081_v60 }
 0x11d   : > { %v1149_v3 = vmax.f32 %v1117_v1, 0.0 }
 0x11e   : > { %v2290_v47 = vpop.f32.mrf.mxu3 }
 0x11f   : > { %v1180_v4 = vadd.f32 %v1179_v58, %v1149_v3 }
 0x120   : > { %v1021_v7 = vpop.f32.mrf.mxu2  ;;  %v508_v9 = vpop.f32.mrf.mxu0 }
 0x121   : > { %v1082_v8 = vadd.f32 %v1021_v7, %v739_v2  ;;  %v741_v10 = vpop.f32.mrf.mxu1  ;;  %v1873_v7 = vld [vmem:[%s2382_s3 + $0x28] sm:$0xff] }
 0x122   : > { %v742_v13 = vadd.f32 %v741_v10, %v508_v9  ;;  %1274 = vmatpush.bf16.msrb.mxu3 %v1873_v7 }
 0x123   : > { %v1118_v11 = vadd.f32 %v2231_v5, %v1082_v8 }
 0x125   : > { %v1150_v14 = vmax.f32 %v1118_v11, 0.0 }
 0x126   : > { %v2295_v56 = vpop.f32.mrf.mxu3 }
 0x127   : > { %v1181_v15 = vadd.f32 %v1180_v4, %v1150_v14 }
 0x128   : > { %v1024_v16 = vpop.f32.mrf.mxu2  ;;  %v510_v17 = vpop.f32.mrf.mxu0 }
 0x129   : > { %v1083_v63 = vadd.f32 %v1024_v16, %v742_v13  ;;  %v743_v18 = vpop.f32.mrf.mxu1 }
 0x12a   : > { %v744_v53 = vadd.f32 %v743_v18, %v510_v17 }
 0x12b   : > { %v1119_v19 = vadd.f32 %v2231_v5, %v1083_v63  ;;  %v1872_v63 = vld [vmem:[%s2382_s3 + $0x20] sm:$0xff] }
 0x12c   : > { %1275 = vmatpush.bf16.msrb.mxu3 %v1872_v63  ;;  %v782_v63 = vadd.f32 %v2281_v31, %v2249_v41 }
 0x12d   : > { %v1151_v21 = vmax.f32 %v1119_v19, 0.0 }
 0x12e   : > { %v1061_v17 = vpop.f32.mrf.mxu3 }
 0x12f   : > { %v1182_v22 = vadd.f32 %v1181_v15, %v1151_v21 }
 0x130   : > { %v1026_v23 = vpop.f32.mrf.mxu2  ;;  %v513_v24 = vpop.f32.mrf.mxu0 }
 0x131   : > { %v746_v6 = vpop.f32.mrf.mxu1  ;;  %v1084_v55 = vadd.f32 %v1026_v23, %v744_v53 }
 0x132   : > { %v747_v54 = vadd.f32 %v746_v6, %v513_v24 }
 0x133   : > { %v1120_v62 = vadd.f32 %v2231_v5, %v1084_v55 }
 0x135   : > { %v1152_v10 = vmax.f32 %v1120_v62, 0.0 }
 0x136   : > { %v1064_v53 = vpop.f32.mrf.mxu3 }
 0x137   : > { %v1183_v23 = vadd.f32 %v1182_v22, %v1152_v10  ;;  %v1870_v22 = vld [vmem:[%s2382_s3 + $0x10] sm:$0xff] }
 0x138   : > { %v1029_v27 = vpop.f32.mrf.mxu2  ;;  %v515_v28 = vpop.f32.mrf.mxu0 }
 0x139   : > { %v748_v30 = vpop.f32.mrf.mxu1  ;;  %v1085_v57 = vadd.f32 %v1029_v27, %v747_v54  ;;  %v1871_v27 = vld [vmem:[%s2382_s3 + $0x18] sm:$0xff] }
 0x13a   : > { %v749_v60 = vadd.f32 %v748_v30, %v515_v28  ;;  %1276 = vmatpush.bf16.msrb.mxu3 %v1871_v27 }
 0x13b   : > { %v1121_v3 = vadd.f32 %v2231_v5, %v1085_v57 }
 0x13d   : > { %v1153_v14 = vmax.f32 %v1121_v3, 0.0 }
 0x13e   : > { %1277 = vmatpush.bf16.msrb.mxu3 %v1870_v22 }
 0x140   : > { %v1031_v32 = vpop.f32.mrf.mxu2  ;;  %v518_v33 = vpop.f32.mrf.mxu0 }
 0x141   : > { %v751_v34 = vpop.f32.mrf.mxu1  ;;  %v1086_v2 = vadd.f32 %v1031_v32, %v749_v60 }
 0x142   : > { %v752_v58 = vadd.f32 %v751_v34, %v518_v33  ;;  %v1184_v33 = vadd.f32 %v1183_v23, %v1153_v14  ;;  %v779_v14 = vadd.f32 %v2279_v26, %v2243_v29  ;;  %v784_v29 = vadd.f32 %v2283_v36, %v2252_v50  ;;  %v1066_v26 = vpop.f32.mrf.mxu3 }
 0x143   : > { %v1122_v11 = vadd.f32 %v2231_v5, %v1086_v2  ;;  %v1095_v2 = vadd.f32 %v2285_v20, %v2259_v0 }
 0x144   : > { %v1100_v27 = vadd.f32 %v1066_v26, %v784_v29 }
 0x145   : > { %v1154_v28 = vmax.f32 %v1122_v11, 0.0 }
 0x148   : > { %v1034_v35 = vpop.f32.mrf.mxu2  ;;  %v520_v37 = vpop.f32.mrf.mxu0 }
 0x149   : > { %v753_v38 = vpop.f32.mrf.mxu1  ;;  %v1087_v4 = vadd.f32 %v1034_v35, %v752_v58 }
 0x14a   : > { %v754_v8 = vadd.f32 %v753_v38, %v520_v37 }
 0x14b   : > { %v1123_v15 = vadd.f32 %v2231_v5, %v1087_v4 }
 0x14d   : > { %v1155_v34 = vmax.f32 %v1123_v15, 0.0  ;;  %v1131_v15 = vadd.f32 %v2231_v5, %v1095_v2 }
 0x150   : > { %v1036_v39 = vpop.f32.mrf.mxu2  ;;  %v523_v40 = vpop.f32.mrf.mxu0 }
 0x151   : > { %v756_v42 = vpop.f32.mrf.mxu1  ;;  %v1088_v13 = vadd.f32 %v1036_v39, %v754_v8 }
 0x152   : > { %v757_v9 = vadd.f32 %v756_v42, %v523_v40  ;;  %v1185_v40 = vadd.f32 %v1184_v33, %v1154_v28 }
 0x153   : > { %v1124_v30 = vadd.f32 %v2231_v5, %v1088_v13 }
 0x155   : > { %v1156_v42 = vmax.f32 %v1124_v30, 0.0 }
 0x158   : > { %v1039_v44 = vpop.f32.mrf.mxu2  ;;  %v525_v45 = vpop.f32.mrf.mxu0 }
 0x159   : > { %v758_v46 = vpop.f32.mrf.mxu1  ;;  %v1089_v18 = vadd.f32 %v1039_v44, %v757_v9  ;;  %v1096_v9 = vadd.f32 %v2290_v47, %v2263_v12  ;;  %v1098_v47 = vadd.f32 %v1061_v17, %v779_v14 }
 0x15a   : > { %v759_v19 = vadd.f32 %v758_v46, %v525_v45  ;;  %v1186_v46 = vadd.f32 %v1185_v40, %v1155_v34 }
 0x15b   : > { %v1125_v35 = vadd.f32 %v2231_v5, %v1089_v18  ;;  %v1132_v12 = vadd.f32 %v2231_v5, %v1096_v9 }
 0x15c   : > { %v1187_v54 = vadd.f32 %v1186_v46, %v1156_v42  ;;  %v1287_v46 = vlaneseq }
 0x15d   : > { %v1157_v48 = vmax.f32 %v1125_v35, 0.0 }
 0x15f   : > { %v1188_v60 = vadd.f32 %v1187_v54, %v1157_v48  ;;  %v1288_v48 = vand.u32 127, %v1287_v46 }
 0x160   : > { %v1041_v49 = vpop.f32.mrf.mxu2  ;;  %v528_v51 = vpop.f32.mrf.mxu0 }
 0x161   : > { %v761_v52 = vpop.f32.mrf.mxu1  ;;  %v1090_v32 = vadd.f32 %v1041_v49, %v759_v19  ;;  %vm1289_vm0 = vcmp.lt.s32.totalorder %v1288_v48, 10 }
 0x162   : > { %v762_v21 = vadd.f32 %v761_v52, %v528_v51  ;;  %v1869_v52 = vld [vmem:[%s2382_s3 + $0x8] sm:$0xff] }
 0x163   : > { %v1126_v43 = vadd.f32 %v2231_v5, %v1090_v32  ;;  %1278 = vmatpush.bf16.msrb.mxu3 %v1869_v52  ;;  %v1136_v32 = vadd.f32 %v2231_v5, %v1100_v27 }
 0x165   : > { %v1158_v55 = vmax.f32 %v1126_v43, 0.0  ;;  %v1168_v34 = vmax.f32 %v1136_v32, 0.0 }
 0x167   : > { %v1189_v3 = vadd.f32 %v1188_v60, %v1158_v55 }
 0x168   : > { %v1044_v59 = vpop.f32.mrf.mxu2  ;;  %v530_v61 = vpop.f32.mrf.mxu0 }
 0x169   : > { %v763_v1 = vpop.f32.mrf.mxu1  ;;  %v1091_v37 = vadd.f32 %v1044_v59, %v762_v21  ;;  %v1163_v21 = vmax.f32 %v1131_v15, 0.0 }
 0x16a   : > { %v764_v38 = vadd.f32 %v763_v1, %v530_v61  ;;  %v1868_v1 = vld [vmem:[%s2382_s3] sm:$0xff] }
 0x16b   : > { %v1127_v49 = vadd.f32 %v2231_v5, %v1091_v37  ;;  %1279 = vmatpush.bf16.msrb.mxu3 %v1868_v1 }
 0x16d   : > { %v1159_v61 = vmax.f32 %v1127_v49, 0.0 }
 0x16f   : > { %v1190_v10 = vadd.f32 %v1189_v3, %v1159_v61 }
 0x170   : > { %v1046_v16 = vpop.f32.mrf.mxu2  ;;  %v533_v24 = vpop.f32.mrf.mxu0 }
 0x171   : > { %v766_v6 = vpop.f32.mrf.mxu1  ;;  %v1092_v44 = vadd.f32 %v1046_v16, %v764_v38  ;;  %v1097_v16 = vadd.f32 %v2295_v56, %v2270_v25  ;;  %v1164_v56 = vmax.f32 %v1132_v12, 0.0 }
 0x172   : > { %v767_v39 = vadd.f32 %v766_v6, %v533_v24  ;;  %v1099_v24 = vadd.f32 %v1064_v53, %v782_v63  ;;  %v1134_v6 = vadd.f32 %v2231_v5, %v1098_v47 }
 0x173   : > { %v1128_v57 = vadd.f32 %v2231_v5, %v1092_v44  ;;  %v1133_v23 = vadd.f32 %v2231_v5, %v1097_v16 }
 0x174   : > { %v1135_v31 = vadd.f32 %v2231_v5, %v1099_v24  ;;  %v1166_v30 = vmax.f32 %v1134_v6, 0.0 }
 0x175   : > { %v1160_v4 = vmax.f32 %v1128_v57, 0.0  ;;  %v1165_v41 = vmax.f32 %v1133_v23, 0.0 }
 0x176   : > { %v1167_v50 = vmax.f32 %v1135_v31, 0.0 }
 0x177   : > { %v1191_v0 = vadd.f32 %v1190_v10, %v1160_v4 }
 0x178   : > { %v1049_v45 = vpop.f32.mrf.mxu2  ;;  %v535_v58 = vpop.f32.mrf.mxu0 }
 0x179   : > { %v1093_v51 = vadd.f32 %v1049_v45, %v767_v39  ;;  %v768_v59 = vpop.f32.mrf.mxu1 }
 0x17a   : > { %v769_v7 = vadd.f32 %v768_v59, %v535_v58 }
 0x17b   : > { %v1129_v62 = vadd.f32 %v2231_v5, %v1093_v51 }
 0x17d   : > { %v1161_v11 = vmax.f32 %v1129_v62, 0.0 }
 0x17f   : > { %v1192_v18 = vadd.f32 %v1191_v0, %v1161_v11 }
 0x180   : > { %v1051_v8 = vpop.f32.mrf.mxu2 }
 0x181   : > { %v1094_v13 = vadd.f32 %v1051_v8, %v769_v7 }
 0x183   : > { %v1130_v20 = vadd.f32 %v2231_v5, %v1094_v13  ;;  %v1285_v5 = vld [vmem:[%s2383_s4] sm:$0x1] }
 0x185   : > { %v1162_v19 = vmax.f32 %v1130_v20, 0.0 }
 0x187   : > { %v1193_v25 = vadd.f32 %v1192_v18, %v1162_v19 }
 0x189   : > { %v1194_v28 = vadd.f32 %v1193_v25, %v1163_v21 }
 0x18b   : > { %v1195_v17 = vadd.f32 %v1194_v28, %v1164_v56 }
 0x18d   : > { %v1196_v33 = vadd.f32 %v1195_v17, %v1165_v41 }
 0x18f   : > { %v1197_v36 = vadd.f32 %v1196_v33, %v1166_v30 }
 0x191   : > { %v1198_v35 = vadd.f32 %v1197_v36, %v1167_v50 }
 0x193   : > { %v1199_v37 = vadd.f32 %v1198_v35, %v1168_v34 }
 0x195   : > { %v1200_v38 = vrot.slane %v1199_v37, 4 }
 0x197   : > { %v1201_v39 = vadd.f32 %v1200_v38, %v1199_v37 }
 0x199   : > { %v1202_v22 = vrot.slane %v1201_v39, 2 }
 0x19b   : > { %v1203_v40 = vadd.f32 %v1202_v22, %v1201_v39 }
 0x19d   : > { %v1204_v42 = vrot.slane %v1203_v40, 1 }
 0x19f   : > { %v1205_v43 = vadd.f32 %v1204_v42, %v1203_v40 }
 0x1a1   : > { %v1206_v44 = vmul.f32 0.00390625, %v1205_v43 }
 0x1a3   : > { %v1207_v45 = vpack.c.bf16 %v1206_v44, %v1206_v44 }
 0x1a5   : > { %1280 = vmatmul.bf16.vlgmr.msrb.gmra.mxu3 %v1207_v45 }
 0x228   : > { %v1281_v49 = vpop.f32.mrf.mxu3 }
 0x229   : > { %v1286_v51 = vadd.f32 %v1285_v5, %v1281_v49 }
 0x22b   : > { %v1290_v52 = vsel %vm1289_vm0, %v1286_v51, -1e+30 }
 0x22c   : > { %v1292_v53 = vsel %vm1291_vm1, %v1290_v52, -inf }
 0x22d   : > { %1293 = vmax.xlane.f32.xlu0 %v1292_v53 }
 0x230   : > { %v1283_v54 = vpop.f32.mrf.mxu3 }
 0x2a0   : > { %v1294_v55 = vpop.xlane.xlu0 %1293 }
 0x2a1   : > { %v1295_v57 = vsub.f32 %v1290_v52, %v1294_v55 }
 0x2a3   : > { %v1296_v58 = vmul.f32 1.442695, %v1295_v57 }
 0x2a5   : > { %1941 = vpow2.f32 %v1296_v58 }
 0x2ab   : > { %v1942_v59 = vpop.eup %1941 }
 0x2ac   : > { %v1298_v60 = vsel %vm1291_vm1, %v1942_v59, 0.0 }
 0x2ad   : > { %1299 = vadd.xlane.f32.xlu0 %v1298_v60 }
 0x320   : > { %v1300_v61 = vpop.xlane.xlu0 %1299 }
 0x321   : > { %1943 = vlog2.f32 %v1300_v61 }
 0x327   : > { %v1944_v62 = vpop.eup %1943 }
 0x328   : > { %v1302_v1 = vmul.f32 0.6931472, %v1944_v62 }
 0x32a   : > { %v1303_v2 = vsub.f32 %v1295_v57, %v1302_v1 }
 0x32c   : > { %1304 = vst [vmem:[%s216_s23] sm:$0x1] %v1303_v2 }
 0x32d   : > { %1972 = shalt.err (!%p1969_p3)
}
 0x32e   : > { %1901 = dma.vmem_to_hbm [thread:$0]  (%p2077_p5), %s1317_s25, 16, %s1319_s26, %s1306_s30  }
 0x32f PF: > { %p1907_p4 = scmp.ge.s32.totalorder %s2007_s21, 2  ;;  %s1330_s12 = sand.u32 1, %s1995_s18  }
 0x330   : > { %s1331_s13 = scalar_lea.sflag [#allocation3], %s1330_s12 }
 0x331   : > { %p1904_p7 = pnand %p1907_p4, %p2081_p6 }
 0x333   : > { %p1905_p8 = pneg %p1904_p7 }
 0x335   : > { %1990 = dma.done.wait (%p1905_p8), %s1331_s13, 16  }
 0x336   : > { %1992 = vsyncadd (%p1905_p8), %s1331_s13, 4294967280  ;;  %p15_p9 = scmp.ge.s32.totalorder %s2064_s24, 4   ;;  %s2387_s18 = smov %s1999_s19 }
 0x337   : > { %s2388_s19 = smov %s2003_s20  ;;  %s2389_s20 = smov %s2075_s27 }
 0x338   : > { %s2390_s21 = smov %s2064_s24  ;;  %17 = sbr.rel (!%p15_p9) target bundleno = 3 (0x3), region = 79 }
 0x33d   :  { %1336 = vsyncpa [#allocation3], 1 }
 0x33e   :  { %1338 = vsyncpa [#allocation3 + $0x1], 1 }

</bundles_post_ra>
